<compile_context>
chip_gen: v5e
topology: v5e:2x2
jax: 0.10.0
libtpu: 0.0.40
codegen_flags: <defaults>
</compile_context>

<pallas_src>
from functools import partial

import jax
import jax.numpy as jnp
from jax.experimental import pallas as pl
from jax.experimental.pallas import tpu as pltpu


# ----------------------------- Pallas kernel ------------------------------ #
def _ts_cnn_kernel(x_ref,        # (TB, L, V)  VMEM
                   wts_ref,      # (1, L, 1)   VMEM
                   bts_ref,      # (1, 1)      SMEM scalar
                   win_ref,      # (1, V)      VMEM
                   bin_ref,      # (1, 1)      SMEM scalar
                   wconv_c_ref,  # (1, C)      VMEM  (conv center tap)
                   bconv_ref,    # (1, C)      VMEM
                   wout_ref,     # (C, O)      VMEM
                   bout_ref,     # (1, O)      VMEM
                   out_ref):     # (TB, O+1+V) VMEM (packed: out | cin | cts)
    x = x_ref[...]                                             # (TB, L, V)

    # compact_ts for all names at once: VPU multiply + reduce over the lag dim.
    cts = jnp.sum(x * wts_ref[...], axis=1) + bts_ref[0, 0]    # (TB, V)

    # compact_in = Linear(V, 1): VPU multiply + lane reduce.
    cin = (jnp.sum(cts * win_ref[...], axis=-1, keepdims=True)
           + bin_ref[0, 0])                                    # (TB, 1)

    # conv1 = Conv1d(1, C, k=5, stride=1, padding=2) over a length-1 sequence:
    # only the center tap contributes -> broadcast mul-add + ReLU on the VPU.
    conv = jnp.maximum(cin * wconv_c_ref[...] + bconv_ref[...], 0.0)  # (TB, C)
    # MaxPool1d(kernel_size=2) on length-1 sequence == identity (see TODO above).

    # out = Linear(C, O): the single MXU matmul.
    out = (jnp.dot(conv, wout_ref[...],
                   preferred_element_type=jnp.float32)
           + bout_ref[...])                                    # (TB, O)

    # One lane-packed output buffer: [out | cin | cts].
    o = out.shape[-1]
    out_ref[:, :o] = out
    out_ref[:, o:o + 1] = cin
    out_ref[:, o + 1:] = cts


# --------------------------- parameter packing ----------------------------- #
def pack_params(params, input_size, output_size, input_lag):
    """Done ONCE at setup (not per forward call)."""
    V = input_size // input_lag
    return {
        "wts_r":   params["w_ts"].reshape(1, input_lag, 1).astype(jnp.float32),
        "bts":     params["b_ts"].reshape(1, 1).astype(jnp.float32),
        "win":     params["w_in"].reshape(1, V).astype(jnp.float32),
        "bin":     params["b_in"].reshape(1, 1).astype(jnp.float32),
        # Conv1d center tap (pad=2 on a length-1 sequence -> only tap 2 hits).
        "wconv_c": params["w_conv"][:, 0, 2].reshape(1, input_size).astype(jnp.float32),
        "bconv":   params["b_conv"].reshape(1, input_size).astype(jnp.float32),
        "wout":    params["w_out"].T.astype(jnp.float32),               # (C, O)
        "bout":    params["b_out"].reshape(1, output_size).astype(jnp.float32),
    }


# ------------------------------- wrapper ---------------------------------- #
@partial(jax.jit, static_argnames=("input_size", "output_size", "input_lag"))
def _ts_cnn_run(x3, packed, *, input_size, output_size, input_lag):
    B, L, V = x3.shape
    C, O = input_size, output_size
    W = O + 1 + V                       # packed output width

    # Batch tiling: keep per-step footprint small and constant (v7x 64 MiB safe).
    MAX_TB = 512
    if B <= MAX_TB:
        TB, Bp = B, B
    else:
        TB = MAX_TB
        Bp = -(-B // TB) * TB
    if Bp != B:
        x3 = jnp.pad(x3, ((0, Bp - B), (0, 0), (0, 0)))
    grid = (Bp // TB,)

    def vmem_full(shape):
        return pl.BlockSpec(shape, lambda i: (0,) * len(shape),
                            memory_space=pltpu.MemorySpace.VMEM)

    smem_scalar = pl.BlockSpec((1, 1), lambda i: (0, 0),
                               memory_space=pltpu.MemorySpace.SMEM)

    cost = pl.CostEstimate(
        flops=int(B) * (2 * V * L + 2 * V + 3 * C + 2 * C * O),
        transcendentals=0,
        bytes_accessed=4 * (Bp * L * V + L + 1 + V + 1 + 2 * C + C * O + O
                            + Bp * W),
    )

    packed_out = pl.pallas_call(
        _ts_cnn_kernel,
        out_shape=jax.ShapeDtypeStruct((Bp, W), jnp.float32),
        grid=grid,
        in_specs=[
            pl.BlockSpec((TB, L, V), lambda i: (i, 0, 0),
                         memory_space=pltpu.MemorySpace.VMEM),   # x
            vmem_full((1, L, 1)),                                # w_ts
            smem_scalar,                                         # b_ts
            vmem_full((1, V)),                                   # w_in
            smem_scalar,                                         # b_in
            vmem_full((1, C)),                                   # conv center tap
            vmem_full((1, C)),                                   # conv bias
            vmem_full((C, O)),                                   # w_out
            vmem_full((1, O)),                                   # b_out
        ],
        out_specs=pl.BlockSpec((TB, W), lambda i: (i, 0),
                               memory_space=pltpu.MemorySpace.VMEM),
        compiler_params=pltpu.CompilerParams(
            dimension_semantics=("parallel",)),
        cost_estimate=cost,
    )(x3, packed["wts_r"], packed["bts"], packed["win"], packed["bin"],
      packed["wconv_c"], packed["bconv"], packed["wout"], packed["bout"])

    out = packed_out[:B, :O]
    cin = packed_out[:B, O:O + 1]
    cts = packed_out[:B, O + 1:]
    return out, cin, cts


def ts_cnn_forward(x_dict, packed, input_size, output_size, input_lag):
    names = list(x_dict.keys())
    V = input_size // input_lag
    assert len(names) == V, "len(x_dict) must equal input_size // input_lag"

    # Glue: each series viewed as (-1, L); stacked lane-dense as (B, L, V).
    x3 = jnp.stack(
        [x_dict[n].reshape(-1, input_lag).astype(jnp.float32) for n in names],
        axis=-1)

    out, cin, cts = _ts_cnn_run(x3, packed, input_size=input_size,
                                output_size=output_size, input_lag=input_lag)
    compact_ts_dict = {n: cts[:, i:i + 1] for i, n in enumerate(names)}
    return out, cin, compact_ts_dict


# --------------------------- pure-JAX reference ---------------------------- #
def ts_cnn_reference(x_dict, params, input_size, output_size, input_lag):
    names = list(x_dict.keys())
    cts = jnp.concatenate(
        [x_dict[n].reshape(-1, input_lag) @ params["w_ts"].T + params["b_ts"]
         for n in names], axis=1)
    cin = cts @ params["w_in"].T + params["b_in"]
    # Conv1d(k=5, pad=2) over a length-1 sequence == center-tap scale + bias.
    conv = cin * params["w_conv"][:, 0, 2][None, :] + params["b_conv"][None, :]
    conv = jnp.maximum(conv, 0.0)
    out = conv @ params["w_out"].T + params["b_out"]
    return out, cin, cts


# ------------------------------ params init -------------------------------- #
def init_params(key, input_size, output_size, input_lag):
    V = input_size // input_lag

    def uniform(k, shape, fan_in):
        bound = 1.0 / jnp.sqrt(jnp.float32(fan_in))
        return jax.random.uniform(k, shape, jnp.float32, -bound, bound)

    ks = jax.random.split(key, 8)
    return {
        "w_ts":   uniform(ks[0], (1, input_lag), input_lag),
        "b_ts":   uniform(ks[1], (1,), input_lag),
        "w_in":   uniform(ks[2], (1, V), V),
        "b_in":   uniform(ks[3], (1,), V),
        "w_conv": uniform(ks[4], (input_size, 1, 5), 5),
        "b_conv": uniform(ks[5], (input_size,), 5),
        "w_out":  uniform(ks[6], (output_size, input_size), input_size),
        "b_out":  uniform(ks[7], (output_size,), input_size),
    }


if __name__ == "__main__":
    input_lag = 8
    num_vars = 4
    input_size = num_vars * input_lag        # 32
    output_size = 4
    batch = 16

    key = jax.random.PRNGKey(0)
    kp, kx = jax.random.split(key)
    params = init_params(kp, input_size, output_size, input_lag)
    packed = pack_params(params, input_size, output_size, input_lag)

    xkeys = jax.random.split(kx, num_vars)
    x_dict = {f"var{i}": jax.random.normal(xkeys[i], (batch, input_lag),
                                           jnp.float32)
              for i in range(num_vars)}

    out, cin, cts_dict = ts_cnn_forward(x_dict, packed, input_size,
                                        output_size, input_lag)
    jax.block_until_ready(out)

    ref_out, ref_cin, ref_cts = ts_cnn_reference(x_dict, params, input_size,
                                                 output_size, input_lag)
    cts = jnp.concatenate([cts_dict[n] for n in x_dict.keys()], axis=1)
    assert out.shape == (batch, output_size)
    assert cin.shape == (batch, 1)
    assert cts.shape == (batch, num_vars)
    assert jnp.allclose(out, ref_out, rtol=1e-3, atol=1e-3)
    assert jnp.allclose(cin, ref_cin, rtol=1e-3, atol=1e-3)
    assert jnp.allclose(cts, ref_cts, rtol=1e-3, atol=1e-3)

    print("KERNEL_OK")
</pallas_src>

<mosaic_0001>
module attributes {stable_mosaic.version = 11 : i64} {
  func.func @_ts_cnn_kernel(%arg0: i32, %arg1: memref<16x8x4xf32, #tpu.memory_space<vmem>>, %arg2: memref<1x8x1xf32, #tpu.memory_space<vmem>>, %arg3: memref<1x1xf32, #tpu.memory_space<smem>>, %arg4: memref<1x4xf32, #tpu.memory_space<vmem>>, %arg5: memref<1x1xf32, #tpu.memory_space<smem>>, %arg6: memref<1x32xf32, #tpu.memory_space<vmem>>, %arg7: memref<1x32xf32, #tpu.memory_space<vmem>>, %arg8: memref<32x4xf32, #tpu.memory_space<vmem>>, %arg9: memref<1x4xf32, #tpu.memory_space<vmem>>, %arg10: memref<16x9xf32, #tpu.memory_space<vmem>>) attributes {dimension_semantics = [#tpu.dimension_semantics<parallel>], iteration_bounds = array<i64: 1>, scalar_prefetch = 0 : i64, scratch_operands = 0 : i64, tpu.core_type = #tpu.core_type<tc>, window_params = [{transform_indices = @transform_0, window_bounds = array<i64: 16, 8, 4>}, {pipeline_mode = #tpu.pipeline_mode<synchronous>, transform_indices = @transform_1, window_bounds = array<i64: 1, 8, 1>}, {transform_indices = @transform_2, window_bounds = array<i64: 1, 1>}, {pipeline_mode = #tpu.pipeline_mode<synchronous>, transform_indices = @transform_3, window_bounds = array<i64: 1, 4>}, {transform_indices = @transform_4, window_bounds = array<i64: 1, 1>}, {pipeline_mode = #tpu.pipeline_mode<synchronous>, transform_indices = @transform_5, window_bounds = array<i64: 1, 32>}, {pipeline_mode = #tpu.pipeline_mode<synchronous>, transform_indices = @transform_6, window_bounds = array<i64: 1, 32>}, {pipeline_mode = #tpu.pipeline_mode<synchronous>, transform_indices = @transform_7, window_bounds = array<i64: 32, 4>}, {pipeline_mode = #tpu.pipeline_mode<synchronous>, transform_indices = @transform_8, window_bounds = array<i64: 1, 4>}, {transform_indices = @transform_9, window_bounds = array<i64: 16, 9>}]} {
    %c0 = arith.constant 0 : index
    %c0_0 = arith.constant 0 : index
    %c0_1 = arith.constant 0 : index
    %0 = vector.load %arg1[%c0, %c0_0, %c0_1] : memref<16x8x4xf32, #tpu.memory_space<vmem>>, vector<16x8x4xf32>
    %c0_2 = arith.constant 0 : index
    %c0_3 = arith.constant 0 : index
    %c0_4 = arith.constant 0 : index
    %1 = vector.load %arg2[%c0_2, %c0_3, %c0_4] : memref<1x8x1xf32, #tpu.memory_space<vmem>>, vector<1x8x1xf32>
    %2 = vector.broadcast %1 : vector<1x8x1xf32> to vector<16x8x4xf32>
    %3 = arith.mulf %0, %2 : vector<16x8x4xf32>
    %cst = arith.constant dense<0.000000e+00> : vector<16x4xf32>
    %4 = vector.multi_reduction <add>, %3, %cst [1] : vector<16x8x4xf32> to vector<16x4xf32>
    %c0_5 = arith.constant 0 : index
    %c0_6 = arith.constant 0 : index
    %5 = memref.load %arg3[%c0_5, %c0_6] : memref<1x1xf32, #tpu.memory_space<smem>>
    %6 = vector.broadcast %5 : f32 to vector<16x4xf32>
    %7 = arith.addf %4, %6 : vector<16x4xf32>
    %c0_7 = arith.constant 0 : index
    %c0_8 = arith.constant 0 : index
    %8 = vector.load %arg4[%c0_7, %c0_8] : memref<1x4xf32, #tpu.memory_space<vmem>>, vector<1x4xf32>
    %9 = vector.broadcast %8 : vector<1x4xf32> to vector<16x4xf32>
    %10 = arith.mulf %7, %9 : vector<16x4xf32>
    %cst_9 = arith.constant dense<0.000000e+00> : vector<16xf32>
    %11 = vector.multi_reduction <add>, %10, %cst_9 [1] : vector<16x4xf32> to vector<16xf32>
    %12 = vector.shape_cast %11 : vector<16xf32> to vector<16x1xf32>
    %c0_10 = arith.constant 0 : index
    %c0_11 = arith.constant 0 : index
    %13 = memref.load %arg5[%c0_10, %c0_11] : memref<1x1xf32, #tpu.memory_space<smem>>
    %14 = vector.broadcast %13 : f32 to vector<16x1xf32>
    %15 = arith.addf %12, %14 : vector<16x1xf32>
    %c0_12 = arith.constant 0 : index
    %c0_13 = arith.constant 0 : index
    %16 = vector.load %arg6[%c0_12, %c0_13] : memref<1x32xf32, #tpu.memory_space<vmem>>, vector<1x32xf32>
    %17 = vector.broadcast %15 : vector<16x1xf32> to vector<16x32xf32>
    %18 = vector.broadcast %16 : vector<1x32xf32> to vector<16x32xf32>
    %19 = arith.mulf %17, %18 : vector<16x32xf32>
    %c0_14 = arith.constant 0 : index
    %c0_15 = arith.constant 0 : index
    %20 = vector.load %arg7[%c0_14, %c0_15] : memref<1x32xf32, #tpu.memory_space<vmem>>, vector<1x32xf32>
    %21 = vector.broadcast %20 : vector<1x32xf32> to vector<16x32xf32>
    %22 = arith.addf %19, %21 : vector<16x32xf32>
    %cst_16 = arith.constant 0.000000e+00 : f32
    %23 = vector.broadcast %cst_16 : f32 to vector<16x32xf32>
    %24 = arith.maximumf %22, %23 : vector<16x32xf32>
    %c0_17 = arith.constant 0 : index
    %c0_18 = arith.constant 0 : index
    %25 = vector.load %arg8[%c0_17, %c0_18] : memref<32x4xf32, #tpu.memory_space<vmem>>, vector<32x4xf32>
    %cst_19 = arith.constant dense<0.000000e+00> : vector<16x4xf32>
    %26 = tpu.matmul %24, %25, %cst_19 {dimension_numbers = #tpu.dot_dimension_numbers<[1], [0], [0], [1], [0, 0, 1, 1], [], []>} : vector<16x32xf32>, vector<32x4xf32>, vector<16x4xf32> -> vector<16x4xf32>
    %c0_20 = arith.constant 0 : index
    %c0_21 = arith.constant 0 : index
    %27 = vector.load %arg9[%c0_20, %c0_21] : memref<1x4xf32, #tpu.memory_space<vmem>>, vector<1x4xf32>
    %28 = vector.broadcast %27 : vector<1x4xf32> to vector<16x4xf32>
    %29 = arith.addf %26, %28 : vector<16x4xf32>
    %c0_22 = arith.constant 0 : index
    %c0_23 = arith.constant 0 : index
    %30 = vector.load %arg10[%c0_22, %c0_23] : memref<16x9xf32, #tpu.memory_space<vmem>>, vector<16x4xf32>
    tpu.vector_store %arg10[%c0_22, %c0_23], %29 {strides = array<i32>} : memref<16x9xf32, #tpu.memory_space<vmem>>, vector<16x4xf32>,
    %c0_24 = arith.constant 0 : index
    %c4 = arith.constant 4 : index
    %31 = vector.load %arg10[%c0_24, %c4] : memref<16x9xf32, #tpu.memory_space<vmem>>, vector<16x1xf32>
    tpu.vector_store %arg10[%c0_24, %c4], %15 {strides = array<i32>} : memref<16x9xf32, #tpu.memory_space<vmem>>, vector<16x1xf32>,
    %c0_25 = arith.constant 0 : index
    %c5 = arith.constant 5 : index
    %32 = vector.load %arg10[%c0_25, %c5] : memref<16x9xf32, #tpu.memory_space<vmem>>, vector<16x4xf32>
    tpu.vector_store %arg10[%c0_25, %c5], %7 {strides = array<i32>} : memref<16x9xf32, #tpu.memory_space<vmem>>, vector<16x4xf32>,
    return
  }
  func.func @transform_0(%arg0: i32) -> (i32, i32, i32) {
    %c0_i32 = arith.constant 0 : i32
    %c0_i32_0 = arith.constant 0 : i32
    %c0_i32_1 = arith.constant 0 : i32
    return %arg0, %c0_i32, %c0_i32_0 : i32, i32, i32
  }
  func.func @transform_1(%arg0: i32) -> (i32, i32, i32) {
    %c0_i32 = arith.constant 0 : i32
    %c0_i32_0 = arith.constant 0 : i32
    %c0_i32_1 = arith.constant 0 : i32
    %c0_i32_2 = arith.constant 0 : i32
    return %c0_i32, %c0_i32_0, %c0_i32_1 : i32, i32, i32
  }
  func.func @transform_2(%arg0: i32) -> (i32, i32) {
    %c0_i32 = arith.constant 0 : i32
    %c0_i32_0 = arith.constant 0 : i32
    %c0_i32_1 = arith.constant 0 : i32
    return %c0_i32, %c0_i32_0 : i32, i32
  }
  func.func @transform_3(%arg0: i32) -> (i32, i32) {
    %c0_i32 = arith.constant 0 : i32
    %c0_i32_0 = arith.constant 0 : i32
    %c0_i32_1 = arith.constant 0 : i32
    return %c0_i32, %c0_i32_0 : i32, i32
  }
  func.func @transform_4(%arg0: i32) -> (i32, i32) {
    %c0_i32 = arith.constant 0 : i32
    %c0_i32_0 = arith.constant 0 : i32
    %c0_i32_1 = arith.constant 0 : i32
    return %c0_i32, %c0_i32_0 : i32, i32
  }
  func.func @transform_5(%arg0: i32) -> (i32, i32) {
    %c0_i32 = arith.constant 0 : i32
    %c0_i32_0 = arith.constant 0 : i32
    %c0_i32_1 = arith.constant 0 : i32
    return %c0_i32, %c0_i32_0 : i32, i32
  }
  func.func @transform_6(%arg0: i32) -> (i32, i32) {
    %c0_i32 = arith.constant 0 : i32
    %c0_i32_0 = arith.constant 0 : i32
    %c0_i32_1 = arith.constant 0 : i32
    return %c0_i32, %c0_i32_0 : i32, i32
  }
  func.func @transform_7(%arg0: i32) -> (i32, i32) {
    %c0_i32 = arith.constant 0 : i32
    %c0_i32_0 = arith.constant 0 : i32
    %c0_i32_1 = arith.constant 0 : i32
    return %c0_i32, %c0_i32_0 : i32, i32
  }
  func.func @transform_8(%arg0: i32) -> (i32, i32) {
    %c0_i32 = arith.constant 0 : i32
    %c0_i32_0 = arith.constant 0 : i32
    %c0_i32_1 = arith.constant 0 : i32
    return %c0_i32, %c0_i32_0 : i32, i32
  }
  func.func @transform_9(%arg0: i32) -> (i32, i32) {
    %c0_i32 = arith.constant 0 : i32
    %c0_i32_0 = arith.constant 0 : i32
    return %arg0, %c0_i32 : i32, i32
  }
}

</mosaic_0001>

<bundles_post_ra>
// kernel: _ts_cnn_run.1
= control target key start
LH: loop header
LB: loop body
LE: loop exit
PB: predicated region body
PF: predicated region fallthrough
CT: control target
= control target key end

     0   :  { %v399_v0 = vmov 0   ;;  %vm72_vm0 = vcmask 31744   ;;  %vm240_vm1 = vcmask 1041409   ;;  %vm243_vm2 = vcmask 1042434   ;;  %s400_s22 = smov 5   ;;  %s654_s1 = inlined_call_operand.vmem [shape: f32[1,8,1], index: 1, kind: input, shape index: {}]   ;;  %s655_s3 = inlined_call_operand.vmem [shape: f32[1,4], index: 3, kind: input, shape index: {}]   ;;  %s656_s5 = inlined_call_operand.vmem [shape: f32[1,32], index: 5, kind: input, shape index: {}]   ;;  %s657_s0 = inlined_call_operand.vmem [shape: f32[16,8,4], index: 0, kind: input, shape index: {}]   ;;  %s658_s2 = inlined_call_operand.<no memory space> [shape: f32[1,1], index: 2, kind: input, shape index: {}]   ;;  %s659_s6 = inlined_call_operand.vmem [shape: f32[1,32], index: 6, kind: input, shape index: {}]   ;;  %s660_s8 = inlined_call_operand.vmem [shape: f32[1,4], index: 8, kind: input, shape index: {}]   ;;  %s661_s7 = inlined_call_operand.vmem [shape: f32[32,4], index: 7, kind: input, shape index: {}]   ;;  %s662_s4 = inlined_call_operand.<no memory space> [shape: f32[1,1], index: 4, kind: input, shape index: {}]   ;;  %s663_s9 = inlined_call_operand.vmem [shape: f32[16,9], index: 9, kind: output, shape index: {}]  }
   0x1   :  { %394 = vset.pattern.permute.xlu0 %v399_v0  ;;  %v50_v1 = vld [vmem:[%s654_s1] sm:$0xff]  ;;  %v43_v3 = vld [vmem:[%s657_s0 + $0x48] sm:$0xff]  ;;  %v44_v4 = vld [vmem:[%s657_s0 + $0x50] sm:$0xff]  ;;  %v483_v11 = vstv %s658_s2  ;;  %vm246_vm3 = vcmask 1043459   ;;  %vm249_vm4 = vcmask 1044484   ;;  %vm252_vm5 = vcmask 1045509  }
   0x2   :  { %53 = vperm.xlu0 %394, %v50_v1   ;;  %v42_v2 = vld [vmem:[%s657_s0 + $0x40] sm:$0xff]  ;;  %v45_v5 = vld [vmem:[%s657_s0 + $0x58] sm:$0xff]  ;;  %v47_v7 = vld [vmem:[%s657_s0 + $0x68] sm:$0xff]  ;;  %vm255_vm6 = vcmask 1046534   ;;  %vm258_vm7 = vcmask 1047559   ;;  %vm308_vm8 = vcmask 261120  }
   0x3   :  { %v46_v6 = vld [vmem:[%s657_s0 + $0x60] sm:$0xff]  ;;  %v48_v8 = vld [vmem:[%s657_s0 + $0x70] sm:$0xff]  ;;  %v49_v9 = vld [vmem:[%s657_s0 + $0x78] sm:$0xff]  ;;  %vm340_vm9 = vcmask 39968   ;;  %vm379_vm10 = vcmask 72744  }
  0x74   :  { %v478_v10 = vpop.permute.xlu0 %53 }
  0x75   :  { %v64_v12 = vmul.f32 %v478_v10, %v42_v2  ;;  %v65_v13 = vmul.f32 %v478_v10, %v43_v3  ;;  %v66_v14 = vmul.f32 %v478_v10, %v44_v4  ;;  %v67_v15 = vmul.f32 %v478_v10, %v45_v5  ;;  %v504_v4 = vld [vmem:[%s655_s3] ss:$0 sm:$0xff] }
  0x76   :  { %v68_v16 = vmul.f32 %v478_v10, %v46_v6  ;;  %v69_v17 = vmul.f32 %v478_v10, %v47_v7  ;;  %v70_v18 = vmul.f32 %v478_v10, %v48_v8  ;;  %v71_v19 = vmul.f32 %v478_v10, %v49_v9 }
  0x77   :  { %v129_v20 = vsel %vm72_vm0, %v64_v12, 0.0  ;;  %v136_v21 = vsel %vm72_vm0, %v65_v13, 0.0  ;;  %v143_v22 = vsel %vm72_vm0, %v66_v14, 0.0  ;;  %v150_v23 = vsel %vm72_vm0, %v67_v15, 0.0 }
  0x78   :  { %v130_v24 = vrot.slane %v129_v20, 4  ;;  %v137_v25 = vrot.slane %v136_v21, 4  ;;  %v144_v26 = vrot.slane %v143_v22, 4  ;;  %v151_v27 = vrot.slane %v150_v23, 4 }
  0x79   :  { %v157_v28 = vsel %vm72_vm0, %v68_v16, 0.0  ;;  %v164_v29 = vsel %vm72_vm0, %v69_v17, 0.0  ;;  %v171_v30 = vsel %vm72_vm0, %v70_v18, 0.0  ;;  %v178_v31 = vsel %vm72_vm0, %v71_v19, 0.0 }
  0x7a   :  { %v131_v32 = vadd.f32 %v130_v24, %v129_v20  ;;  %v138_v33 = vadd.f32 %v137_v25, %v136_v21  ;;  %v145_v34 = vadd.f32 %v144_v26, %v143_v22  ;;  %v152_v35 = vadd.f32 %v151_v27, %v150_v23 }
  0x7b   :  { %v158_v36 = vrot.slane %v157_v28, 4  ;;  %v165_v37 = vrot.slane %v164_v29, 4  ;;  %v172_v38 = vrot.slane %v171_v30, 4  ;;  %v179_v39 = vrot.slane %v178_v31, 4 }
  0x7c   :  { %v132_v40 = vrot.slane %v131_v32, 2  ;;  %v139_v41 = vrot.slane %v138_v33, 2  ;;  %v146_v42 = vrot.slane %v145_v34, 2  ;;  %v153_v43 = vrot.slane %v152_v35, 2 }
  0x7d   :  { %v159_v44 = vadd.f32 %v158_v36, %v157_v28  ;;  %v166_v45 = vadd.f32 %v165_v37, %v164_v29  ;;  %v173_v46 = vadd.f32 %v172_v38, %v171_v30  ;;  %v180_v47 = vadd.f32 %v179_v39, %v178_v31  ;;  %v34_v39 = vld [vmem:[%s657_s0] sm:$0xff] }
  0x7e   :  { %v133_v48 = vadd.f32 %v132_v40, %v131_v32  ;;  %v140_v49 = vadd.f32 %v139_v41, %v138_v33  ;;  %v147_v50 = vadd.f32 %v146_v42, %v145_v34  ;;  %v154_v51 = vadd.f32 %v153_v43, %v152_v35  ;;  %v35_v40 = vld [vmem:[%s657_s0 + $0x8] sm:$0xff] }
  0x7f   :  { %v160_v52 = vrot.slane %v159_v44, 2  ;;  %v167_v53 = vrot.slane %v166_v45, 2  ;;  %v174_v54 = vrot.slane %v173_v46, 2  ;;  %v181_v55 = vrot.slane %v180_v47, 2 }
  0x80   :  { %v134_v56 = vrot.slane %v133_v48, 1  ;;  %v141_v57 = vrot.slane %v140_v49, 1  ;;  %v148_v58 = vrot.slane %v147_v50, 1  ;;  %v155_v59 = vrot.slane %v154_v51, 1 }
  0x81   :  { %v161_v60 = vadd.f32 %v160_v52, %v159_v44  ;;  %v168_v61 = vadd.f32 %v167_v53, %v166_v45  ;;  %v175_v62 = vadd.f32 %v174_v54, %v173_v46  ;;  %v182_v63 = vadd.f32 %v181_v55, %v180_v47  ;;  %v36_v45 = vld [vmem:[%s657_s0 + $0x10] sm:$0xff]  ;;  %v37_v46 = vld [vmem:[%s657_s0 + $0x18] sm:$0xff]  ;;  %v38_v47 = vld [vmem:[%s657_s0 + $0x20] sm:$0xff] }
  0x82   :  { %v135_v0 = vadd.f32 %v134_v56, %v133_v48  ;;  %v142_v1 = vadd.f32 %v141_v57, %v140_v49  ;;  %v149_v2 = vadd.f32 %v148_v58, %v147_v50  ;;  %v156_v3 = vadd.f32 %v155_v59, %v154_v51  ;;  %v39_v52 = vld [vmem:[%s657_s0 + $0x28] sm:$0xff]  ;;  %v40_v53 = vld [vmem:[%s657_s0 + $0x30] sm:$0xff]  ;;  %v41_v54 = vld [vmem:[%s657_s0 + $0x38] sm:$0xff] }
  0x83   :  { %v162_v5 = vrot.slane %v161_v60, 1  ;;  %v169_v6 = vrot.slane %v168_v61, 1  ;;  %v176_v7 = vrot.slane %v175_v62, 1  ;;  %v183_v8 = vrot.slane %v182_v63, 1 }
  0x84   :  { %v195_v9 = vadd.f32 %v483_v11, %v135_v0  ;;  %v196_v12 = vadd.f32 %v483_v11, %v142_v1  ;;  %v197_v13 = vadd.f32 %v483_v11, %v149_v2  ;;  %v198_v14 = vadd.f32 %v483_v11, %v156_v3 }
  0x85   :  { %v163_v15 = vadd.f32 %v162_v5, %v161_v60  ;;  %v170_v16 = vadd.f32 %v169_v6, %v168_v61  ;;  %v177_v17 = vadd.f32 %v176_v7, %v175_v62  ;;  %v184_v18 = vadd.f32 %v183_v8, %v182_v63 }
  0x86   :  { %v366_v19 = vsel %vm240_vm1, %v196_v12, %v195_v9  ;;  %v215_v20 = vmul.f32 %v504_v4, %v195_v9  ;;  %v216_v21 = vmul.f32 %v504_v4, %v196_v12  ;;  %v217_v22 = vmul.f32 %v504_v4, %v197_v13 }
  0x87   :  { %v199_v23 = vadd.f32 %v483_v11, %v163_v15  ;;  %v200_v24 = vadd.f32 %v483_v11, %v170_v16  ;;  %v201_v25 = vadd.f32 %v483_v11, %v177_v17  ;;  %v202_v26 = vadd.f32 %v483_v11, %v184_v18 }
  0x88   :  { %v367_v27 = vsel %vm243_vm2, %v197_v13, %v366_v19  ;;  %v218_v28 = vmul.f32 %v504_v4, %v198_v14  ;;  %v260_v29 = vrot.slane %v216_v21, 7  ;;  %v262_v30 = vrot.slane %v217_v22, 6 }
  0x89   :  { %v368_v31 = vsel %vm246_vm3, %v198_v14, %v367_v27  ;;  %v219_v32 = vmul.f32 %v504_v4, %v199_v23  ;;  %v220_v33 = vmul.f32 %v504_v4, %v200_v24  ;;  %v221_v34 = vmul.f32 %v504_v4, %v201_v25 }
  0x8a   :  { %v369_v35 = vsel %vm249_vm4, %v199_v23, %v368_v31  ;;  %v222_v36 = vmul.f32 %v504_v4, %v202_v26  ;;  %v261_v37 = vsel %vm240_vm1, %v260_v29, %v215_v20  ;;  %v264_v38 = vrot.slane %v218_v28, 5 }
  0x8b   :  { %v370_v41 = vsel %vm252_vm5, %v200_v24, %v369_v35  ;;  %v263_v42 = vsel %vm243_vm2, %v262_v30, %v261_v37  ;;  %v266_v43 = vrot.slane %v219_v32, 4  ;;  %v268_v44 = vrot.slane %v220_v33, 3 }
  0x8c   :  { %v371_v48 = vsel %vm255_vm6, %v201_v25, %v370_v41  ;;  %v265_v49 = vsel %vm246_vm3, %v264_v38, %v263_v42  ;;  %v270_v50 = vrot.slane %v221_v34, 2  ;;  %v272_v51 = vrot.slane %v222_v36, 1 }
  0x8d   :  { %v372_v55 = vsel %vm258_vm7, %v202_v26, %v371_v48  ;;  %v267_v56 = vsel %vm249_vm4, %v266_v43, %v265_v49  ;;  %v56_v57 = vmul.f32 %v478_v10, %v34_v39  ;;  %v57_v58 = vmul.f32 %v478_v10, %v35_v40 }
  0x8e   :  { %375 = vrot.lane.b32.xlu2 %v372_v55, %s400_s22  ;;  %v269_v59 = vsel %vm252_vm5, %v268_v44, %v267_v56  ;;  %v58_v60 = vmul.f32 %v478_v10, %v36_v45  ;;  %v59_v61 = vmul.f32 %v478_v10, %v37_v46  ;;  %v60_v62 = vmul.f32 %v478_v10, %v38_v47 }
  0x8f   :  { %v271_v63 = vsel %vm255_vm6, %v270_v50, %v269_v59  ;;  %v61_v0 = vmul.f32 %v478_v10, %v39_v52  ;;  %v62_v1 = vmul.f32 %v478_v10, %v40_v53  ;;  %v63_v2 = vmul.f32 %v478_v10, %v41_v54 }
  0x90   :  { %v273_v3 = vsel %vm258_vm7, %v272_v51, %v271_v63  ;;  %v73_v5 = vsel %vm72_vm0, %v56_v57, 0.0  ;;  %v80_v6 = vsel %vm72_vm0, %v57_v58, 0.0  ;;  %v87_v7 = vsel %vm72_vm0, %v58_v60, 0.0 }
  0x91   :  { %v279_v8 = vsel %vm72_vm0, %v273_v3, 0.0  ;;  %v74_v9 = vrot.slane %v73_v5, 4  ;;  %v81_v12 = vrot.slane %v80_v6, 4  ;;  %v88_v13 = vrot.slane %v87_v7, 4 }
  0x92   :  { %280 = vadd.xlane.f32.xlu1 %v279_v8  ;;  %v94_v14 = vsel %vm72_vm0, %v59_v61, 0.0  ;;  %v101_v15 = vsel %vm72_vm0, %v60_v62, 0.0  ;;  %v108_v10 = vsel %vm72_vm0, %v61_v0, 0.0  ;;  %v115_v16 = vsel %vm72_vm0, %v62_v1, 0.0 }
  0x93   :  { %v75_v17 = vadd.f32 %v74_v9, %v73_v5  ;;  %v82_v18 = vadd.f32 %v81_v12, %v80_v6  ;;  %v89_v19 = vadd.f32 %v88_v13, %v87_v7  ;;  %v95_v20 = vrot.slane %v94_v14, 4 }
  0x94   :  { %v102_v21 = vrot.slane %v101_v15, 4  ;;  %v109_v22 = vrot.slane %v108_v10, 4  ;;  %v116_v23 = vrot.slane %v115_v16, 4  ;;  %v122_v24 = vsel %vm72_vm0, %v63_v2, 0.0 }
  0x95   :  { %v76_v25 = vrot.slane %v75_v17, 2  ;;  %v83_v26 = vrot.slane %v82_v18, 2  ;;  %v90_v27 = vrot.slane %v89_v19, 2  ;;  %v96_v28 = vadd.f32 %v95_v20, %v94_v14 }
  0x96   :  { %v103_v29 = vadd.f32 %v102_v21, %v101_v15  ;;  %v110_v30 = vadd.f32 %v109_v22, %v108_v10  ;;  %v117_v31 = vadd.f32 %v116_v23, %v115_v16  ;;  %v123_v32 = vrot.slane %v122_v24, 4 }
  0x97   :  { %v77_v33 = vadd.f32 %v76_v25, %v75_v17  ;;  %v84_v34 = vadd.f32 %v83_v26, %v82_v18  ;;  %v91_v35 = vadd.f32 %v90_v27, %v89_v19  ;;  %v97_v36 = vrot.slane %v96_v28, 2 }
  0x98   :  { %v104_v37 = vrot.slane %v103_v29, 2  ;;  %v111_v38 = vrot.slane %v110_v30, 2  ;;  %v118_v39 = vrot.slane %v117_v31, 2  ;;  %v124_v40 = vadd.f32 %v123_v32, %v122_v24 }
  0x99   :  { %v78_v41 = vrot.slane %v77_v33, 1  ;;  %v85_v42 = vrot.slane %v84_v34, 1  ;;  %v92_v43 = vrot.slane %v91_v35, 1  ;;  %v98_v44 = vadd.f32 %v97_v36, %v96_v28 }
  0x9a   :  { %v105_v45 = vadd.f32 %v104_v37, %v103_v29  ;;  %v112_v46 = vadd.f32 %v111_v38, %v110_v30  ;;  %v119_v47 = vadd.f32 %v118_v39, %v117_v31  ;;  %v125_v48 = vrot.slane %v124_v40, 2  ;;  %v303_v37 = vld [vmem:[%s661_s7 + $0x18] sm:$0xff]  ;;  %v302_v38 = vld [vmem:[%s661_s7 + $0x10] sm:$0xff] }
  0x9b   :  { %v79_v49 = vadd.f32 %v78_v41, %v77_v33  ;;  %v86_v50 = vadd.f32 %v85_v42, %v84_v34  ;;  %v93_v51 = vadd.f32 %v92_v43, %v91_v35  ;;  %v99_v52 = vrot.slane %v98_v44, 1  ;;  %327 = vmatpush.msra.mxu0 %v303_v37  ;;  %388 = vmatpush.msra.mxu1 %v303_v37  ;;  %v396_v41 = vld [vmem:[%s656_s5] ss:$0 sm:$0xff] }
  0x9c   :  { %v106_v53 = vrot.slane %v105_v45, 1  ;;  %v113_v54 = vrot.slane %v112_v46, 1  ;;  %v120_v55 = vrot.slane %v119_v47, 1  ;;  %v126_v56 = vadd.f32 %v125_v48, %v124_v40  ;;  %v301_v40 = vld [vmem:[%s661_s7 + $0x8] sm:$0xff]  ;;  %v300_v43 = vld [vmem:[%s661_s7] sm:$0xff] }
  0x9d   :  { %v100_v57 = vadd.f32 %v99_v52, %v98_v44  ;;  %v187_v58 = vadd.f32 %v483_v11, %v79_v49  ;;  %v188_v59 = vadd.f32 %v483_v11, %v86_v50  ;;  %v189_v60 = vadd.f32 %v483_v11, %v93_v51  ;;  %328 = vmatpush.msra.mxu0 %v302_v38 }
  0x9e   :  { %v107_v61 = vadd.f32 %v106_v53, %v105_v45  ;;  %v114_v62 = vadd.f32 %v113_v54, %v112_v46  ;;  %v121_v63 = vadd.f32 %v120_v55, %v119_v47  ;;  %v127_v0 = vrot.slane %v126_v56, 1  ;;  %389 = vmatpush.msra.mxu1 %v302_v38  ;;  %v397_v45 = vld [vmem:[%s659_s6] ss:$0 sm:$0xff] }
  0x9f   :  { %v190_v1 = vadd.f32 %v483_v11, %v100_v57  ;;  %v207_v2 = vmul.f32 %v504_v4, %v187_v58  ;;  %v208_v3 = vmul.f32 %v504_v4, %v188_v59  ;;  %v209_v5 = vmul.f32 %v504_v4, %v189_v60  ;;  %329 = vmatpush.msra.mxu0 %v301_v40  ;;  %v398_v54 = vld [vmem:[%s660_s8] ss:$0 sm:$0xff] }
  0xa0   :  { %v128_v6 = vadd.f32 %v127_v0, %v126_v56  ;;  %v191_v7 = vadd.f32 %v483_v11, %v107_v61  ;;  %v192_v8 = vadd.f32 %v483_v11, %v114_v62  ;;  %v193_v9 = vadd.f32 %v483_v11, %v121_v63  ;;  %390 = vmatpush.msra.mxu1 %v301_v40 }
  0xa1   :  { %v210_v12 = vmul.f32 %v504_v4, %v190_v1  ;;  %v239_v13 = vrot.slane %v208_v3, 7  ;;  %v242_v14 = vrot.slane %v209_v5, 6  ;;  %v359_v15 = vsel %vm240_vm1, %v188_v59, %v187_v58  ;;  %330 = vmatpush.msra.mxu0 %v300_v43 }
  0xa2   :  { %v194_v10 = vadd.f32 %v483_v11, %v128_v6  ;;  %v211_v16 = vmul.f32 %v504_v4, %v191_v7  ;;  %v212_v17 = vmul.f32 %v504_v4, %v192_v8  ;;  %v213_v18 = vmul.f32 %v504_v4, %v193_v9  ;;  %391 = vmatpush.msra.mxu1 %v300_v43 }
  0xa3   :  { %v241_v19 = vsel %vm240_vm1, %v239_v13, %v207_v2  ;;  %v245_v20 = vrot.slane %v210_v12, 5  ;;  %v360_v21 = vsel %vm243_vm2, %v189_v60, %v359_v15  ;;  %v283_v39 = vstv %s662_s4 }
  0xa4   :  { %v214_v22 = vmul.f32 %v504_v4, %v194_v10  ;;  %v244_v23 = vsel %vm243_vm2, %v242_v14, %v241_v19  ;;  %v248_v24 = vrot.slane %v211_v16, 4  ;;  %v251_v26 = vrot.slane %v212_v17, 3 }
  0xa5   :  { %v247_v25 = vsel %vm246_vm3, %v245_v20, %v244_v23  ;;  %v361_v11 = vsel %vm246_vm3, %v190_v1, %v360_v21  ;;  %v254_v28 = vrot.slane %v213_v18, 2 }
  0xa6   :  { %v250_v27 = vsel %vm249_vm4, %v248_v24, %v247_v25  ;;  %v362_v29 = vsel %vm249_vm4, %v191_v7, %v361_v11  ;;  %v257_v31 = vrot.slane %v214_v22, 1 }
  0xa7   :  { %v253_v30 = vsel %vm252_vm5, %v251_v26, %v250_v27  ;;  %v363_v32 = vsel %vm252_vm5, %v192_v8, %v362_v29 }
  0xa8   :  { %v256_v4 = vsel %vm255_vm6, %v254_v28, %v253_v30  ;;  %v364_v33 = vsel %vm255_vm6, %v193_v9, %v363_v32 }
  0xa9   :  { %v259_v34 = vsel %vm258_vm7, %v257_v31, %v256_v4  ;;  %v365_v36 = vsel %vm258_vm7, %v194_v10, %v364_v33 }
  0xaa   :  { %v276_v35 = vsel %vm72_vm0, %v259_v34, 0.0 }
  0xab   :  { %277 = vadd.xlane.f32.xlu0 %v276_v35  ;;  %373 = vrot.lane.b32.xlu1 %v365_v36, %s400_s22 }
  0xe8   :  { %v376_v57 = vpop.permute.xlu2 %375 }
 0x105   :  { %v281_v42 = vpop.xlane.xlu1 %280 }
 0x106   :  { %v285_v44 = vadd.f32 %v283_v39, %v281_v42 }
 0x108   :  { %v291_v46 = vmul.f32 %v396_v41, %v285_v44 }
 0x10a   :  { %v297_v47 = vadd.f32 %v397_v45, %v291_v46 }
 0x10c   :  { %v299_v48 = vmax.f32 %v297_v47, 0.0 }
 0x10e   :  { %387 = vmatmul.msk.f32.vlgmr.msra.gmra.mxu1 %vm308_vm8, %v299_v48 }
 0x11d   :  { %v374_v60 = vpop.permute.xlu1 %373 }
 0x11e   :  { %v278_v49 = vpop.xlane.xlu0 %277 }
 0x11f   :  { %v284_v50 = vadd.f32 %v283_v39, %v278_v49 }
 0x121   :  { %v290_v51 = vmul.f32 %v396_v41, %v284_v50 }
 0x123   :  { %v296_v52 = vadd.f32 %v397_v45, %v290_v51 }
 0x125   :  { %v298_v53 = vmax.f32 %v296_v52, 0.0 }
 0x127   :  { %386 = vmatmul.msk.f32.vlgmr.msra.gmra.mxu0 %vm308_vm8, %v298_v53 }
 0x18b   :  { %v335_v55 = vpop.f32.mrf.mxu1 }
 0x18c   :  { %v336_v56 = vadd.f32 %v398_v54, %v335_v55 }
 0x18e   :  { %339 = vst.msk [vmem:[%s663_s9 + $0x8] sm:$0xff] %vm72_vm0, %v336_v56 }
 0x18f   :  { %342 = vst.msk [vmem:[%s663_s9 + $0x8] sm:$0xff] %vm340_vm9, %v285_v44 }
 0x190   :  { %381 = vst.msk [vmem:[%s663_s9 + $0x8] sm:$0xff] %vm379_vm10, %v376_v57 }
 0x1a4   :  { %v332_v58 = vpop.f32.mrf.mxu0 }
 0x1a5   :  { %v333_v59 = vadd.f32 %v398_v54, %v332_v58 }
 0x1a7   :  { %338 = vst.msk [vmem:[%s663_s9] sm:$0xff] %vm72_vm0, %v333_v59 }
 0x1a8   :  { %341 = vst.msk [vmem:[%s663_s9] sm:$0xff] %vm340_vm9, %v284_v50 }
 0x1a9   :  { %380 = vst.msk [vmem:[%s663_s9] sm:$0xff] %vm379_vm10, %v374_v60 }

</bundles_post_ra>
